<compile_context>
chip_gen: v5e
topology: v5e:2x2
jax: 0.10.0
libtpu: 0.0.40
codegen_flags: <defaults>
</compile_context>

<pallas_src>
import functools

import jax
import jax.numpy as jnp
from jax.experimental import pallas as pl
from jax.experimental.pallas import tpu as pltpu

_HID = 100
_HID_PAD = 128


def _round_up(n, m):
    return ((n + m - 1) // m) * m


def _res_mlp_kernel(qu_ref, w1_ref, b1_ref, w2_ref, b2_ref, wout_ref, o_ref,
                    *, x_dim):
    """out = q + fout(relu(f2(relu(f1(qu)))));  q = qu[:, :x_dim]."""
    qu = qu_ref[...]
    # f1: single fused K-padded dot (replaces the old K=4 + K=1 pair).
    h1 = jnp.dot(qu, w1_ref[...], preferred_element_type=jnp.float32)
    h1 = jnp.maximum(h1 + b1_ref[...].astype(jnp.float32), 0.0)
    h1 = h1.astype(w2_ref.dtype)
    # f2
    h2 = jnp.dot(h1, w2_ref[...], preferred_element_type=jnp.float32)
    h2 = jnp.maximum(h2 + b2_ref[...].astype(jnp.float32), 0.0)
    h2 = h2.astype(wout_ref.dtype)
    # fout (no bias)
    delta = jnp.dot(h2, wout_ref[...], preferred_element_type=jnp.float32)
    # residual from the first x_dim lanes of qu
    q = qu[:, :x_dim].astype(jnp.float32)
    o_ref[...] = q + delta


def _batch_dim_semantics():
    """CORE_PARALLEL on v7x (2 TCs/chip), plain 'parallel' elsewhere."""
    try:
        kind = jax.devices()[0].device_kind.lower()
    except Exception:
        kind = ""
    if "v7" in kind and hasattr(pltpu, "CORE_PARALLEL"):
        return (pltpu.CORE_PARALLEL,)
    return ("parallel",)


def res_model_forward(params, q_t_, q_t, u_t=None, *, block_b=2048):
    """Pallas wrapper matching Res_model.forward (encoder=False)."""
    del q_t_  # unused in the PyTorch forward as well

    x_dim = params["x_dim"]
    u_dim = params["u_dim"]
    w1, b1, w2, b2, wout = (params["w1"], params["b1"], params["w2"],
                            params["b2"], params["wout"])
    k_pad = w1.shape[0]
    hid = w2.shape[1]
    cdtype = w1.dtype  # compute dtype for matmul operands (f32 or bf16)

    assert q_t.shape[1] == x_dim, "q_t width must equal params x_dim"
    if u_t is None:
        assert u_dim == 0, "u_t=None requires params built with u_dim == 0"
        pieces = [q_t.astype(cdtype)]
        width = x_dim
    else:
        assert u_t.shape[1] == u_dim, "u_t width must equal params u_dim"
        pieces = [q_t.astype(cdtype), u_t.astype(cdtype)]
        width = x_dim + u_dim
    if width < k_pad:  # zero-pad K up to the stored (multiple-of-8) width
        pieces.append(jnp.zeros((q_t.shape[0], k_pad - width), cdtype))
    qu = jnp.concatenate(pieces, axis=1)

    B = q_t.shape[0]
    kernel = functools.partial(_res_mlp_kernel, x_dim=x_dim)
    weights = (w1, b1, w2, b2, wout)

    if B <= block_b:
        # Small problem: whole thing resident in VMEM, no pipeline scaffolding.
        vmem = pl.BlockSpec(memory_space=pltpu.MemorySpace.VMEM)
        return pl.pallas_call(
            kernel,
            out_shape=jax.ShapeDtypeStruct((B, x_dim), jnp.float32),
            in_specs=[vmem] * (1 + len(weights)),
            out_specs=vmem,
        )(qu, *weights)

    # Large B: tile the batch with a cdiv grid; pad B up to a block multiple
    # (padded rows are pure garbage-in/garbage-out and sliced away below).
    n_blocks = pl.cdiv(B, block_b)
    b_pad = n_blocks * block_b
    if b_pad != B:
        qu = jnp.pad(qu, ((0, b_pad - B), (0, 0)))

    w_bytes = sum(int(w.size) * w.dtype.itemsize for w in weights)
    flops = 2 * b_pad * (k_pad * hid + hid * hid + hid * x_dim)
    cost = pl.CostEstimate(
        flops=flops,
        transcendentals=0,
        bytes_accessed=int(qu.size) * qu.dtype.itemsize
        + b_pad * x_dim * 4 + w_bytes)

    # Per-step VMEM estimate: double-buffered qu/out blocks + h1/h2 + weights.
    itemsize = jnp.dtype(cdtype).itemsize
    vmem_est = (2 * block_b * k_pad * itemsize
                + 2 * block_b * x_dim * 4
                + 2 * block_b * hid * 4
                + w_bytes)
    cp_kwargs = dict(dimension_semantics=_batch_dim_semantics())
    if vmem_est > 12 * 1024 * 1024:  # v5e default scoped limit is 16 MiB
        cp_kwargs["vmem_limit_bytes"] = min(2 * int(vmem_est), 100 * 1024 * 1024)

    def w_spec(a):
        nd = a.ndim
        return pl.BlockSpec(a.shape, lambda i, _nd=nd: (0,) * _nd)

    out = pl.pallas_call(
        kernel,
        out_shape=jax.ShapeDtypeStruct((b_pad, x_dim), jnp.float32),
        grid=(n_blocks,),
        in_specs=[pl.BlockSpec((block_b, k_pad), lambda i: (i, 0))]
        + [w_spec(w) for w in weights],
        out_specs=pl.BlockSpec((block_b, x_dim), lambda i: (i, 0)),
        compiler_params=pltpu.CompilerParams(**cp_kwargs),
        cost_estimate=cost,
    )(qu, *weights)
    return out[:B] if b_pad != B else out


def init_params(key, x_dim, u_dim, hid=_HID, hid_pad=_HID_PAD,
                dtype=jnp.float32):
    """PyTorch-Linear-like uniform fan-in init, TPU-friendly padding.

    * hidden dim zero-padded hid -> hid_pad (=128): extra lanes contribute
      exactly zero through matmul / bias / ReLU, so math matches hid=100.
    * f1 weight stored as a single [k_pad, hid_pad] matrix whose first x_dim
      rows act on q_t and next u_dim rows on u_t (concat fused into one dot);
      k_pad is x_dim+u_dim rounded up to a multiple of 8 with zero rows.
    * dtype=jnp.bfloat16 enables the bf16-operand / f32-accumulate fast path
      (numerics differ from fp32 at ~1e-2 relative; keep fp32 for exactness).
    """
    k1, k2, k3, k4, k5 = jax.random.split(key, 5)
    in1 = x_dim + u_dim
    k_pad = max(8, _round_up(in1, 8))

    def u(k, shape, fan_in):
        bound = 1.0 / jnp.sqrt(jnp.float32(fan_in))
        return jax.random.uniform(k, shape, jnp.float32, -bound, bound)

    w1 = u(k1, (in1, hid), in1)        # f1.weight^T   (q rows then u rows)
    b1 = u(k2, (1, hid), in1)          # f1.bias (2-D for TPU layout)
    w2 = u(k3, (hid, hid), hid)        # f2.weight^T
    b2 = u(k4, (1, hid), hid)          # f2.bias
    wout = u(k5, (hid, x_dim), hid)    # fout.weight^T (bias=False)

    ph = hid_pad - hid
    return {
        "x_dim": x_dim,
        "u_dim": u_dim,
        "w1": jnp.pad(w1, ((0, k_pad - in1), (0, ph))).astype(dtype),
        "b1": jnp.pad(b1, ((0, 0), (0, ph))).astype(dtype),
        "w2": jnp.pad(w2, ((0, ph), (0, ph))).astype(dtype),
        "b2": jnp.pad(b2, ((0, 0), (0, ph))).astype(dtype),
        "wout": jnp.pad(wout, ((0, ph), (0, 0))).astype(dtype),
    }


def _reference(params, q_t, u_t):
    """Pure-JAX reference mirroring the kernel's operand-dtype behaviour."""
    x_dim = params["x_dim"]
    k_pad = params["w1"].shape[0]
    cdtype = params["w1"].dtype
    pieces = [q_t.astype(cdtype)]
    width = x_dim
    if u_t is not None:
        pieces.append(u_t.astype(cdtype))
        width += u_t.shape[1]
    if width < k_pad:
        pieces.append(jnp.zeros((q_t.shape[0], k_pad - width), cdtype))
    qu = jnp.concatenate(pieces, axis=1)
    h1 = jnp.maximum(
        jnp.dot(qu, params["w1"], preferred_element_type=jnp.float32)
        + params["b1"].astype(jnp.float32), 0.0).astype(cdtype)
    h2 = jnp.maximum(
        jnp.dot(h1, params["w2"], preferred_element_type=jnp.float32)
        + params["b2"].astype(jnp.float32), 0.0).astype(cdtype)
    delta = jnp.dot(h2, params["wout"], preferred_element_type=jnp.float32)
    return q_t.astype(jnp.float32) + delta


if __name__ == "__main__":
    B, X_DIM, U_DIM = 8, 4, 1

    key = jax.random.PRNGKey(0)
    kp, kq_, kq, ku = jax.random.split(key, 4)

    params = init_params(kp, X_DIM, U_DIM)
    q_t_ = jax.random.normal(kq_, (B, X_DIM), jnp.float32)
    q_t = jax.random.normal(kq, (B, X_DIM), jnp.float32)
    u_t = jax.random.normal(ku, (B, U_DIM), jnp.float32)

    # 1) small (whole-problem-in-VMEM) path, fp32 — exact vs reference
    out = jax.block_until_ready(res_model_forward(params, q_t_, q_t, u_t))
    ref = _reference(params, q_t, u_t)
    assert out.shape == (B, X_DIM)
    assert jnp.allclose(out, ref, atol=1e-5, rtol=1e-5)

    # 2) tiled path with a non-divisible batch (exercises cdiv grid + padding)
    BB = 2500
    qb = jax.random.normal(kq, (BB, X_DIM), jnp.float32)
    ub = jax.random.normal(ku, (BB, U_DIM), jnp.float32)
    outb = jax.block_until_ready(
        res_model_forward(params, None, qb, ub, block_b=1024))
    refb = _reference(params, qb, ub)
    assert outb.shape == (BB, X_DIM)
    assert jnp.allclose(outb, refb, atol=1e-4, rtol=1e-4)

    # 3) opt-in bf16-operand / f32-accumulate fast path (looser numerics)
    params_bf16 = init_params(kp, X_DIM, U_DIM, dtype=jnp.bfloat16)
    outh = jax.block_until_ready(
        res_model_forward(params_bf16, None, qb, ub, block_b=1024))
    refh = _reference(params_bf16, qb, ub)
    assert outh.shape == (BB, X_DIM)
    assert jnp.allclose(outh, refh, atol=2e-2, rtol=2e-2)

    print("KERNEL_OK")
</pallas_src>

<mosaic_0001>
module attributes {stable_mosaic.version = 11 : i64} {
  func.func @_res_mlp_kernel(%arg0: memref<8x8xf32, #tpu.memory_space<vmem>>, %arg1: memref<8x128xf32, #tpu.memory_space<vmem>>, %arg2: memref<1x128xf32, #tpu.memory_space<vmem>>, %arg3: memref<128x128xf32, #tpu.memory_space<vmem>>, %arg4: memref<1x128xf32, #tpu.memory_space<vmem>>, %arg5: memref<128x4xf32, #tpu.memory_space<vmem>>, %arg6: memref<8x4xf32, #tpu.memory_space<vmem>>) attributes {dimension_semantics = [], scalar_prefetch = 0 : i64, scratch_operands = 0 : i64, tpu.core_type = #tpu.core_type<tc>} {
    %c0 = arith.constant 0 : index
    %c0_0 = arith.constant 0 : index
    %0 = vector.load %arg0[%c0, %c0_0] : memref<8x8xf32, #tpu.memory_space<vmem>>, vector<8x8xf32>
    %c0_1 = arith.constant 0 : index
    %c0_2 = arith.constant 0 : index
    %1 = vector.load %arg1[%c0_1, %c0_2] : memref<8x128xf32, #tpu.memory_space<vmem>>, vector<8x128xf32>
    %cst = arith.constant dense<0.000000e+00> : vector<8x128xf32>
    %2 = tpu.matmul %0, %1, %cst {dimension_numbers = #tpu.dot_dimension_numbers<[1], [0], [0], [1], [0, 0, 1, 1], [], []>} : vector<8x8xf32>, vector<8x128xf32>, vector<8x128xf32> -> vector<8x128xf32>
    %c0_3 = arith.constant 0 : index
    %c0_4 = arith.constant 0 : index
    %3 = vector.load %arg2[%c0_3, %c0_4] : memref<1x128xf32, #tpu.memory_space<vmem>>, vector<1x128xf32>
    %4 = vector.broadcast %3 : vector<1x128xf32> to vector<8x128xf32>
    %5 = arith.addf %2, %4 : vector<8x128xf32>
    %cst_5 = arith.constant 0.000000e+00 : f32
    %6 = vector.broadcast %cst_5 : f32 to vector<8x128xf32>
    %7 = arith.maximumf %5, %6 : vector<8x128xf32>
    %c0_6 = arith.constant 0 : index
    %c0_7 = arith.constant 0 : index
    %8 = vector.load %arg3[%c0_6, %c0_7] : memref<128x128xf32, #tpu.memory_space<vmem>>, vector<128x128xf32>
    %cst_8 = arith.constant dense<0.000000e+00> : vector<8x128xf32>
    %9 = tpu.matmul %7, %8, %cst_8 {dimension_numbers = #tpu.dot_dimension_numbers<[1], [0], [0], [1], [0, 0, 1, 1], [], []>} : vector<8x128xf32>, vector<128x128xf32>, vector<8x128xf32> -> vector<8x128xf32>
    %c0_9 = arith.constant 0 : index
    %c0_10 = arith.constant 0 : index
    %10 = vector.load %arg4[%c0_9, %c0_10] : memref<1x128xf32, #tpu.memory_space<vmem>>, vector<1x128xf32>
    %11 = vector.broadcast %10 : vector<1x128xf32> to vector<8x128xf32>
    %12 = arith.addf %9, %11 : vector<8x128xf32>
    %cst_11 = arith.constant 0.000000e+00 : f32
    %13 = vector.broadcast %cst_11 : f32 to vector<8x128xf32>
    %14 = arith.maximumf %12, %13 : vector<8x128xf32>
    %c0_12 = arith.constant 0 : index
    %c0_13 = arith.constant 0 : index
    %15 = vector.load %arg5[%c0_12, %c0_13] : memref<128x4xf32, #tpu.memory_space<vmem>>, vector<128x4xf32>
    %cst_14 = arith.constant dense<0.000000e+00> : vector<8x4xf32>
    %16 = tpu.matmul %14, %15, %cst_14 {dimension_numbers = #tpu.dot_dimension_numbers<[1], [0], [0], [1], [0, 0, 1, 1], [], []>} : vector<8x128xf32>, vector<128x4xf32>, vector<8x4xf32> -> vector<8x4xf32>
    %17 = vector.extract_strided_slice %0 {offsets = [0, 0], sizes = [8, 4], strides = [1, 1]} : vector<8x8xf32> to vector<8x4xf32>
    %18 = arith.addf %17, %16 : vector<8x4xf32>
    %c0_15 = arith.constant 0 : index
    %c0_16 = arith.constant 0 : index
    %19 = vector.load %arg6[%c0_15, %c0_16] : memref<8x4xf32, #tpu.memory_space<vmem>>, vector<8x4xf32>
    tpu.vector_store %arg6[%c0_15, %c0_16], %18 {strides = array<i32>} : memref<8x4xf32, #tpu.memory_space<vmem>>, vector<8x4xf32>,
    return
  }
}

</mosaic_0001>

<bundles_post_ra>
// kernel: tpu_custom_call.1
= control target key start
LH: loop header
LB: loop body
LE: loop exit
PB: predicated region body
PF: predicated region fallthrough
CT: control target
= control target key end

     0   :  { %11 = vsyncpa [#allocation3], 0  ;;  %s377_s0 = inlined_call_operand.hbm [shape: f32[8,8], index: 0, kind: input, shape index: {}]   ;;  %s378_s1 = inlined_call_operand.hbm [shape: f32[8,128], index: 1, kind: input, shape index: {}]   ;;  %s379_s2 = inlined_call_operand.vmem [shape: f32[1,128], index: 2, kind: input, shape index: {}]   ;;  %s380_s3 = inlined_call_operand.vmem [shape: f32[128,128], index: 3, kind: input, shape index: {}]   ;;  %s381_s4 = inlined_call_operand.vmem [shape: f32[1,128], index: 4, kind: input, shape index: {}]   ;;  %s382_s5 = inlined_call_operand.vmem [shape: f32[128,4], index: 5, kind: input, shape index: {}]   ;;  %s383_s6 = inlined_call_operand.vmem [shape: f32[8,4], index: 6, kind: output, shape index: {}]  }
   0x1   :  { %s18_s23 = sshll.u32 %s377_s0, 4  ;;  %s19_s23 = int_to_ptr.hbm [resolvable:$true] %s18_s23 }
   0x2   :  { %12 = vsyncpa [#allocation5], 0  ;;  %s225_s24 = smov [#allocation2]   ;;  %s29_s28 = sshll.u32 %s378_s1, 4  ;;  %s30_s28 = int_to_ptr.hbm [resolvable:$true] %s29_s28 }
   0x3   :  { %s20_s25 = sshll.u32 %s225_s24, 4  ;;  %s226_s29 = smov [#allocation4]   ;;  %s21_s25 = int_to_ptr.vmem [resolvable:$true] %s20_s25 }
   0x4   :  { %23 = dma.hbm_to_vmem [thread:$0]  %s19_s23, 128, %s21_s25, [#allocation3]  }
   0x5   :  { %s31_s30 = sshll.u32 %s226_s29, 4  ;;  %s32_s30 = int_to_ptr.vmem [resolvable:$true] %s31_s30 }
   0x6   :  { %34 = dma.hbm_to_vmem [thread:$0]  %s30_s28, 128, %s32_s30, [#allocation5]  }
   0x7   :  { %221 = dma.done.wait [#allocation3], 128  }
   0x8   :  { %222 = vsyncadd [#allocation3], 4294967168 }
   0x9   :  { %223 = dma.done.wait [#allocation5], 128  }
   0xa   :  { %224 = vsyncadd [#allocation5], 4294967168  ;;  %vm57_vm0 = vcmask 64512   ;;  %v52_v0 = vld [vmem:[#allocation4] sm:$0xff]  ;;  %v268_v1 = vld [vmem:[#allocation2] sm:$0xff]  ;;  %vm160_vm1 = vcmask 31744  }
   0xb   :  { %v97_v2 = vld [vmem:[%s380_s3 + $0x78] sm:$0xff]  ;;  %76 = vmatpush.msra.mxu0 %v52_v0  ;;  %v96_v3 = vld [vmem:[%s380_s3 + $0x70] sm:$0xff]  ;;  %v95_v4 = vld [vmem:[%s380_s3 + $0x68] sm:$0xff] }
   0xc   :  { %102 = vmatpush.msra.mxu1 %v97_v2  ;;  %168 = vmatmul.msk.f32.vlgmr.msra.gmra.mxu0 %vm57_vm0, %v268_v1  ;;  %v94_v5 = vld [vmem:[%s380_s3 + $0x60] sm:$0xff]  ;;  %v93_v6 = vld [vmem:[%s380_s3 + $0x58] sm:$0xff]  ;;  %v92_v7 = vld [vmem:[%s380_s3 + $0x50] sm:$0xff] }
   0xd   :  { %v91_v8 = vld [vmem:[%s380_s3 + $0x48] sm:$0xff]  ;;  %v90_v9 = vld [vmem:[%s380_s3 + $0x40] sm:$0xff]  ;;  %v89_v10 = vld [vmem:[%s380_s3 + $0x38] sm:$0xff] }
   0xe   :  { %103 = vmatpush.msra.mxu1 %v96_v3  ;;  %v88_v11 = vld [vmem:[%s380_s3 + $0x30] sm:$0xff]  ;;  %v87_v12 = vld [vmem:[%s380_s3 + $0x28] sm:$0xff]  ;;  %v86_v13 = vld [vmem:[%s380_s3 + $0x20] sm:$0xff] }
   0xf   :  { %v85_v14 = vld [vmem:[%s380_s3 + $0x18] sm:$0xff]  ;;  %v84_v15 = vld [vmem:[%s380_s3 + $0x10] sm:$0xff]  ;;  %v83_v16 = vld [vmem:[%s380_s3 + $0x8] sm:$0xff] }
  0x10   :  { %104 = vmatpush.msra.mxu1 %v95_v4  ;;  %v82_v17 = vld [vmem:[%s380_s3] sm:$0xff]  ;;  %v138_v18 = vld [vmem:[%s382_s5 + $0x78] sm:$0xff]  ;;  %v137_v19 = vld [vmem:[%s382_s5 + $0x70] sm:$0xff] }
  0x11   :  { %139 = vmatpush.msra.mxu2 %v138_v18  ;;  %v136_v20 = vld [vmem:[%s382_s5 + $0x68] sm:$0xff]  ;;  %v135_v21 = vld [vmem:[%s382_s5 + $0x60] sm:$0xff]  ;;  %v134_v22 = vld [vmem:[%s382_s5 + $0x58] sm:$0xff] }
  0x12   :  { %105 = vmatpush.msra.mxu1 %v94_v5  ;;  %v133_v23 = vld [vmem:[%s382_s5 + $0x50] sm:$0xff]  ;;  %v132_v24 = vld [vmem:[%s382_s5 + $0x48] sm:$0xff]  ;;  %v131_v25 = vld [vmem:[%s382_s5 + $0x40] sm:$0xff] }
  0x13   :  { %140 = vmatpush.msra.mxu2 %v137_v19  ;;  %v130_v26 = vld [vmem:[%s382_s5 + $0x38] sm:$0xff]  ;;  %v129_v27 = vld [vmem:[%s382_s5 + $0x30] sm:$0xff]  ;;  %v128_v28 = vld [vmem:[%s382_s5 + $0x28] sm:$0xff] }
  0x14   :  { %106 = vmatpush.msra.mxu1 %v93_v6  ;;  %v127_v29 = vld [vmem:[%s382_s5 + $0x20] sm:$0xff]  ;;  %v126_v30 = vld [vmem:[%s382_s5 + $0x18] sm:$0xff]  ;;  %v125_v35 = vld [vmem:[%s382_s5 + $0x10] sm:$0xff] }
  0x15   :  { %141 = vmatpush.msra.mxu2 %v136_v20  ;;  %v171_v31 = vld [vmem:[%s379_s2] ss:$0 sm:$0xff]  ;;  %v124_v36 = vld [vmem:[%s382_s5 + $0x8] sm:$0xff] }
  0x16   :  { %107 = vmatpush.msra.mxu1 %v92_v7  ;;  %v123_v37 = vld [vmem:[%s382_s5] sm:$0xff] }
  0x17   :  { %142 = vmatpush.msra.mxu2 %v135_v21  ;;  %v172_v38 = vld [vmem:[%s381_s4] ss:$0 sm:$0xff] }
  0x18   :  { %108 = vmatpush.msra.mxu1 %v91_v8 }
  0x19   :  { %143 = vmatpush.msra.mxu2 %v134_v22 }
  0x1a   :  { %109 = vmatpush.msra.mxu1 %v90_v9 }
  0x1b   :  { %144 = vmatpush.msra.mxu2 %v133_v23 }
  0x1c   :  { %110 = vmatpush.msra.mxu1 %v89_v10 }
  0x1d   :  { %145 = vmatpush.msra.mxu2 %v132_v24 }
  0x1e   :  { %111 = vmatpush.msra.mxu1 %v88_v11 }
  0x1f   :  { %146 = vmatpush.msra.mxu2 %v131_v25 }
  0x20   :  { %112 = vmatpush.msra.mxu1 %v87_v12 }
  0x21   :  { %147 = vmatpush.msra.mxu2 %v130_v26 }
  0x22   :  { %113 = vmatpush.msra.mxu1 %v86_v13 }
  0x23   :  { %148 = vmatpush.msra.mxu2 %v129_v27 }
  0x24   :  { %114 = vmatpush.msra.mxu1 %v85_v14 }
  0x25   :  { %149 = vmatpush.msra.mxu2 %v128_v28 }
  0x26   :  { %115 = vmatpush.msra.mxu1 %v84_v15 }
  0x27   :  { %150 = vmatpush.msra.mxu2 %v127_v29 }
  0x28   :  { %116 = vmatpush.msra.mxu1 %v83_v16 }
  0x29   :  { %151 = vmatpush.msra.mxu2 %v126_v30 }
  0x2a   :  { %117 = vmatpush.msra.mxu1 %v82_v17 }
  0x2b   :  { %152 = vmatpush.msra.mxu2 %v125_v35 }
  0x2d   :  { %153 = vmatpush.msra.mxu2 %v124_v36 }
  0x2f   :  { %154 = vmatpush.msra.mxu2 %v123_v37 }
  0x89   :  { %v78_v32 = vpop.f32.mrf.mxu0 }
  0x8a   :  { %v79_v33 = vadd.f32 %v171_v31, %v78_v32 }
  0x8c   :  { %v81_v34 = vmax.f32 %v79_v33, 0.0 }
  0x8e   :  { %118 = vmatmul.f32.vlgmr.msra.gmra.mxu1 %v81_v34 }
 0x10b   :  { %v119_v39 = vpop.f32.mrf.mxu1 }
 0x10c   :  { %v120_v40 = vadd.f32 %v172_v38, %v119_v39 }
 0x10e   :  { %v122_v41 = vmax.f32 %v120_v40, 0.0 }
 0x110   :  { %155 = vmatmul.f32.vlgmr.msra.gmra.mxu2 %v122_v41 }
 0x193   :  { %v156_v42 = vpop.f32.mrf.mxu2 }
 0x194   :  { %v159_v43 = vadd.f32 %v156_v42, %v268_v1 }
 0x196   :  { %161 = vst.msk [vmem:[%s383_s6] sm:$0xff] %vm160_vm1, %v159_v43 }
 0x197   :  { %166 = vsyncpa [#allocation3], 1 }
 0x198   :  { %167 = vsyncpa [#allocation5], 1 }

</bundles_post_ra>
